<compile_context>
chip_gen: v7x
topology: tpu7x:2x2x1
jax: 0.10.0
libtpu: 0.0.40
codegen_flags: <defaults>
</compile_context>

<pallas_src>
import math
import functools

import jax
import jax.numpy as jnp
from jax.experimental import pallas as pl
from jax.experimental.pallas import tpu as pltpu

LN_EPS = 1e-5


def att_encoder_kernel(x_ref, w_ref, b_ref, g_ref, beta_ref, o_ref,
                       *, y_dim, bt, seq):
    # x_ref    : (bt*seq, Dx)   bf16, flattened by the BlockSpec / wrapper
    # w_ref    : (Dx, 3*Dy)     bf16 fused [W_k | W_q*scale | W_v]
    # b_ref    : (1, 3*Dy)      f32 fused bias (b_q pre-scaled)
    # g_ref    : (1, Dy)        LayerNorm gamma
    # beta_ref : (1, Dy)        LayerNorm beta
    # o_ref    : (bt*seq, Dy)

    # ---- fused QKV projection: one (bt*S, Dx) @ (Dx, 3*Dy) MXU matmul ----
    kqv = jnp.dot(x_ref[...], w_ref[...], preferred_element_type=jnp.float32)
    kqv = kqv + b_ref[...]                                   # single bias broadcast

    key2 = kqv[:, 0 * y_dim:1 * y_dim]
    query2 = kqv[:, 1 * y_dim:2 * y_dim]                     # softmax scale folded into W_q/b_q
    value2 = kqv[:, 2 * y_dim:3 * y_dim]                     # kept f32 for residual / LN path

    # Sublane-only reshapes (seq is a multiple of 8 -> no tile-crossing relayout).
    key = key2.reshape(bt, seq, y_dim)
    query = query2.reshape(bt, seq, y_dim)
    value = value2.reshape(bt, seq, y_dim)

    # ---- scores = (Q*scale) K^T : batched contraction over the feature dim ----
    scores = jax.lax.dot_general(
        query.astype(jnp.bfloat16), key.astype(jnp.bfloat16),
        dimension_numbers=(((2,), (2,)), ((0,), (0,))),
        preferred_element_type=jnp.float32)                  # (bt, S, S) f32

    # ---- numerically stable softmax in f32, exact normalization ----
    m = jnp.max(scores, axis=-1, keepdims=True)
    p = jnp.exp(scores - m)
    att = p / jnp.sum(p, axis=-1, keepdims=True)

    # ---- attention output: att @ V, bf16 MXU inputs, f32 accumulation ----
    y = jax.lax.dot_general(
        att.astype(jnp.bfloat16), value.astype(jnp.bfloat16),
        dimension_numbers=(((2,), (1,)), ((0,), (0,))),
        preferred_element_type=jnp.float32)                  # (bt, S, Dy)

    y2 = y.reshape(bt * seq, y_dim)                          # back to lane-dense 2D slab

    # ---- LayerNorm (biased variance, eps=1e-5, affine) in f32, then residual ----
    mean = jnp.mean(y2, axis=-1, keepdims=True)
    centered = y2 - mean
    var = jnp.mean(centered * centered, axis=-1, keepdims=True)
    y_norm = centered * jax.lax.rsqrt(var + LN_EPS)
    y_norm = y_norm * g_ref[...] + beta_ref[...]

    # TODO(synk): nn.Dropout(0.15) is identity at inference; training-mode dropout not implemented.
    o_ref[...] = (y_norm + value2).astype(o_ref.dtype)


def _default_block_b(batch):
    """Generation-aware grid sizing: 2 parallel steps on 2-TC v7x, else 1 step."""
    try:
        kind = jax.devices()[0].device_kind.lower()
    except Exception:
        kind = ""
    if "v7" in kind and batch >= 2 and batch % 2 == 0:
        return batch // 2
    return batch


def att_encoder(x, wk, bk, wq, bq, wv, bv, gamma, beta, *, block_b=None, out_dtype=None):
    B, S, Dx = x.shape
    Dy = wk.shape[1]
    if out_dtype is None:
        out_dtype = x.dtype
    if block_b is None:
        block_b = _default_block_b(B)
    assert B % block_b == 0, "block_b must divide batch"

    # Fold the 1/sqrt(Dy) softmax scale into the Q projection (in f32, before
    # the bf16 cast), then fuse the three projections into one weight/bias.
    scale = 1.0 / math.sqrt(float(Dy))
    w_kqv = jnp.concatenate([wk, wq * scale, wv], axis=1).astype(jnp.bfloat16)
    b_kqv = jnp.concatenate([bk, bq * scale, bv], axis=0).reshape(1, 3 * Dy).astype(jnp.float32)
    g2 = gamma.reshape(1, Dy).astype(jnp.float32)
    be2 = beta.reshape(1, Dy).astype(jnp.float32)

    # Present lane-dense 2D slabs to the kernel; flatten via BlockSpec, cast x
    # to bf16 once here (halves the x DMA bytes, drops an in-kernel VPU cast).
    x2 = x.reshape(B * S, Dx).astype(jnp.bfloat16)

    rows = block_b * S
    kernel = functools.partial(att_encoder_kernel, y_dim=Dy, bt=block_b, seq=S)

    out2 = pl.pallas_call(
        kernel,
        out_shape=jax.ShapeDtypeStruct((B * S, Dy), out_dtype),
        grid_spec=pltpu.PrefetchScalarGridSpec(
            num_scalar_prefetch=0,
            grid=(B // block_b,),
            in_specs=[
                pl.BlockSpec((rows, Dx), lambda b: (b, 0)),      # x slab
                pl.BlockSpec((Dx, 3 * Dy), lambda b: (0, 0)),    # fused W_kqv (resident)
                pl.BlockSpec((1, 3 * Dy), lambda b: (0, 0)),     # fused bias
                pl.BlockSpec((1, Dy), lambda b: (0, 0)),         # gamma
                pl.BlockSpec((1, Dy), lambda b: (0, 0)),         # beta
            ],
            out_specs=pl.BlockSpec((rows, Dy), lambda b: (b, 0)),
        ),
        compiler_params=pltpu.CompilerParams(
            dimension_semantics=("parallel",)),
    )(x2, w_kqv, b_kqv, g2, be2)

    return out2.reshape(B, S, Dy)


# ---------------------------- references ----------------------------

def att_encoder_ref_f32(x, wk, bk, wq, bq, wv, bv, gamma, beta):
    key = x @ wk + bk
    query = x @ wq + bq
    value = x @ wv + bv
    scores = jnp.einsum("bqd,bkd->bqk", query, key) / math.sqrt(query.shape[-1])
    att = jax.nn.softmax(scores, axis=-1)
    y = jnp.einsum("bqk,bkd->bqd", att, value)
    mean = y.mean(-1, keepdims=True)
    var = ((y - mean) ** 2).mean(-1, keepdims=True)
    yn = (y - mean) / jnp.sqrt(var + LN_EPS) * gamma + beta
    return yn + value


def att_encoder_ref_bf16(x, wk, bk, wq, bq, wv, bv, gamma, beta):
    # Mirrors the kernel's recipe exactly: scale folded into W_q/b_q before the
    # bf16 cast, bf16 MXU operands with f32 accumulation, f32 softmax/LayerNorm.
    bf = jnp.bfloat16
    Dy = wk.shape[1]
    scale = 1.0 / math.sqrt(float(Dy))
    w = jnp.concatenate([wk, wq * scale, wv], axis=1).astype(bf)
    b = jnp.concatenate([bk, bq * scale, bv], axis=0).astype(jnp.float32)
    kqv = jnp.einsum("bsd,de->bse", x.astype(bf), w,
                     preferred_element_type=jnp.float32) + b
    key, query, value = kqv[..., :Dy], kqv[..., Dy:2 * Dy], kqv[..., 2 * Dy:]
    scores = jnp.einsum("bqd,bkd->bqk", query.astype(bf), key.astype(bf),
                        preferred_element_type=jnp.float32)
    att = jax.nn.softmax(scores, axis=-1)
    y = jnp.einsum("bqk,bkd->bqd", att.astype(bf), value.astype(bf),
                   preferred_element_type=jnp.float32)
    mean = y.mean(-1, keepdims=True)
    var = ((y - mean) ** 2).mean(-1, keepdims=True)
    yn = (y - mean) / jnp.sqrt(var + LN_EPS) * gamma + beta
    return yn + value


if __name__ == "__main__":
    # Small shapes consistent with the module (x_dim -> y_dim projections).
    B, S, X_DIM, Y_DIM = 4, 8, 64, 128

    key = jax.random.PRNGKey(0)
    kx, k1, k2, k3, k4, k5, k6 = jax.random.split(key, 7)

    x = jax.random.normal(kx, (B, S, X_DIM), dtype=jnp.float32)

    lim = 1.0 / math.sqrt(X_DIM)
    wk = jax.random.uniform(k1, (X_DIM, Y_DIM), minval=-lim, maxval=lim, dtype=jnp.float32)
    bk = jax.random.uniform(k2, (Y_DIM,), minval=-lim, maxval=lim, dtype=jnp.float32)
    wq = jax.random.uniform(k3, (X_DIM, Y_DIM), minval=-lim, maxval=lim, dtype=jnp.float32)
    bq = jax.random.uniform(k4, (Y_DIM,), minval=-lim, maxval=lim, dtype=jnp.float32)
    wv = jax.random.uniform(k5, (X_DIM, Y_DIM), minval=-lim, maxval=lim, dtype=jnp.float32)
    bv = jax.random.uniform(k6, (Y_DIM,), minval=-lim, maxval=lim, dtype=jnp.float32)
    gamma = jnp.ones((Y_DIM,), jnp.float32)   # nn.LayerNorm default affine
    beta = jnp.zeros((Y_DIM,), jnp.float32)

    out = att_encoder(x, wk, bk, wq, bq, wv, bv, gamma, beta)
    out = jax.block_until_ready(out)
    assert out.shape == (B, S, Y_DIM)

    # Tight check vs a reference using the same bf16-MXU / f32-accumulate recipe.
    ref_bf16 = att_encoder_ref_bf16(x, wk, bk, wq, bq, wv, bv, gamma, beta)
    assert jnp.allclose(out, ref_bf16, atol=1e-2, rtol=1e-2), "mismatch vs bf16-matmul reference"

    # Loose sanity check vs the pure-f32 reference (error budget = bf16 MXU inputs).
    ref_f32 = att_encoder_ref_f32(x, wk, bk, wq, bq, wv, bv, gamma, beta)
    assert jnp.allclose(out, ref_f32, atol=1e-1, rtol=1e-1), "mismatch vs f32 reference"

    print("KERNEL_OK")
</pallas_src>

<mosaic_0001>
module attributes {stable_mosaic.version = 11 : i64} {
  func.func @att_encoder_kernel(%arg0: i32, %arg1: memref<32x64xbf16, #tpu.memory_space<vmem>>, %arg2: memref<64x384xbf16, #tpu.memory_space<vmem>>, %arg3: memref<1x384xf32, #tpu.memory_space<vmem>>, %arg4: memref<1x128xf32, #tpu.memory_space<vmem>>, %arg5: memref<1x128xf32, #tpu.memory_space<vmem>>, %arg6: memref<32x128xf32, #tpu.memory_space<vmem>>) attributes {dimension_semantics = [#tpu.dimension_semantics<parallel>], iteration_bounds = array<i64: 1>, scalar_prefetch = 0 : i64, scratch_operands = 0 : i64, tpu.core_type = #tpu.core_type<tc>, window_params = [{transform_indices = @transform_0, window_bounds = array<i64: 32, 64>}, {pipeline_mode = #tpu.pipeline_mode<synchronous>, transform_indices = @transform_1, window_bounds = array<i64: 64, 384>}, {pipeline_mode = #tpu.pipeline_mode<synchronous>, transform_indices = @transform_2, window_bounds = array<i64: 1, 384>}, {pipeline_mode = #tpu.pipeline_mode<synchronous>, transform_indices = @transform_3, window_bounds = array<i64: 1, 128>}, {pipeline_mode = #tpu.pipeline_mode<synchronous>, transform_indices = @transform_4, window_bounds = array<i64: 1, 128>}, {transform_indices = @transform_5, window_bounds = array<i64: 32, 128>}]} {
    %c0 = arith.constant 0 : index
    %c0_0 = arith.constant 0 : index
    %0 = vector.load %arg1[%c0, %c0_0] : memref<32x64xbf16, #tpu.memory_space<vmem>>, vector<32x64xbf16>
    %c0_1 = arith.constant 0 : index
    %c0_2 = arith.constant 0 : index
    %1 = vector.load %arg2[%c0_1, %c0_2] : memref<64x384xbf16, #tpu.memory_space<vmem>>, vector<64x384xbf16>
    %cst = arith.constant dense<0.000000e+00> : vector<32x384xf32>
    %2 = tpu.matmul %0, %1, %cst {dimension_numbers = #tpu.dot_dimension_numbers<[1], [0], [0], [1], [0, 0, 1, 1], [], []>} : vector<32x64xbf16>, vector<64x384xbf16>, vector<32x384xf32> -> vector<32x384xf32>
    %c0_3 = arith.constant 0 : index
    %c0_4 = arith.constant 0 : index
    %3 = vector.load %arg3[%c0_3, %c0_4] : memref<1x384xf32, #tpu.memory_space<vmem>>, vector<1x384xf32>
    %4 = vector.broadcast %3 : vector<1x384xf32> to vector<32x384xf32>
    %5 = arith.addf %2, %4 : vector<32x384xf32>
    %6 = vector.extract_strided_slice %5 {offsets = [0, 0], sizes = [32, 128], strides = [1, 1]} : vector<32x384xf32> to vector<32x128xf32>
    %7 = vector.extract_strided_slice %5 {offsets = [0, 128], sizes = [32, 128], strides = [1, 1]} : vector<32x384xf32> to vector<32x128xf32>
    %8 = vector.extract_strided_slice %5 {offsets = [0, 256], sizes = [32, 128], strides = [1, 1]} : vector<32x384xf32> to vector<32x128xf32>
    %9 = vector.shape_cast %6 : vector<32x128xf32> to vector<4x8x128xf32>
    %10 = vector.shape_cast %7 : vector<32x128xf32> to vector<4x8x128xf32>
    %11 = vector.shape_cast %8 : vector<32x128xf32> to vector<4x8x128xf32>
    %12 = arith.truncf %10 : vector<4x8x128xf32> to vector<4x8x128xbf16>
    %13 = arith.truncf %9 : vector<4x8x128xf32> to vector<4x8x128xbf16>
    %cst_5 = arith.constant dense<0.000000e+00> : vector<4x8x8xf32>
    %14 = tpu.matmul %12, %13, %cst_5 {dimension_numbers = #tpu.dot_dimension_numbers<[2], [2], [1], [1], [0, 0, 0, 1, 1, 1], [0], [0]>} : vector<4x8x128xbf16>, vector<4x8x128xbf16>, vector<4x8x8xf32> -> vector<4x8x8xf32>
    %cst_6 = arith.constant dense<0xFF800000> : vector<4x8xf32>
    %15 = vector.multi_reduction <maximumf>, %14, %cst_6 [2] : vector<4x8x8xf32> to vector<4x8xf32>
    %16 = vector.shape_cast %15 : vector<4x8xf32> to vector<4x8x1xf32>
    %17 = vector.broadcast %16 : vector<4x8x1xf32> to vector<4x8x8xf32>
    %18 = arith.subf %14, %17 : vector<4x8x8xf32>
    %19 = math.exp %18 : vector<4x8x8xf32>
    %cst_7 = arith.constant dense<0.000000e+00> : vector<4x8xf32>
    %20 = vector.multi_reduction <add>, %19, %cst_7 [2] : vector<4x8x8xf32> to vector<4x8xf32>
    %21 = vector.shape_cast %20 : vector<4x8xf32> to vector<4x8x1xf32>
    %22 = vector.broadcast %21 : vector<4x8x1xf32> to vector<4x8x8xf32>
    %23 = arith.divf %19, %22 : vector<4x8x8xf32>
    %24 = arith.truncf %23 : vector<4x8x8xf32> to vector<4x8x8xbf16>
    %25 = arith.truncf %11 : vector<4x8x128xf32> to vector<4x8x128xbf16>
    %cst_8 = arith.constant dense<0.000000e+00> : vector<4x8x128xf32>
    %26 = tpu.matmul %24, %25, %cst_8 {dimension_numbers = #tpu.dot_dimension_numbers<[2], [1], [1], [2], [0, 0, 0, 1, 1, 2], [0], [0]>} : vector<4x8x8xbf16>, vector<4x8x128xbf16>, vector<4x8x128xf32> -> vector<4x8x128xf32>
    %27 = vector.shape_cast %26 : vector<4x8x128xf32> to vector<32x128xf32>
    %cst_9 = arith.constant dense<0.000000e+00> : vector<32xf32>
    %28 = vector.multi_reduction <add>, %27, %cst_9 [1] : vector<32x128xf32> to vector<32xf32>
    %29 = vector.shape_cast %28 : vector<32xf32> to vector<32x1xf32>
    %cst_10 = arith.constant 1.280000e+02 : f32
    %30 = vector.broadcast %cst_10 : f32 to vector<32x1xf32>
    %31 = arith.divf %29, %30 : vector<32x1xf32>
    %32 = vector.broadcast %31 : vector<32x1xf32> to vector<32x128xf32>
    %33 = arith.subf %27, %32 : vector<32x128xf32>
    %34 = arith.mulf %33, %33 : vector<32x128xf32>
    %cst_11 = arith.constant dense<0.000000e+00> : vector<32xf32>
    %35 = vector.multi_reduction <add>, %34, %cst_11 [1] : vector<32x128xf32> to vector<32xf32>
    %36 = vector.shape_cast %35 : vector<32xf32> to vector<32x1xf32>
    %cst_12 = arith.constant 1.280000e+02 : f32
    %37 = vector.broadcast %cst_12 : f32 to vector<32x1xf32>
    %38 = arith.divf %36, %37 : vector<32x1xf32>
    %cst_13 = arith.constant 9.99999974E-6 : f32
    %39 = vector.broadcast %cst_13 : f32 to vector<32x1xf32>
    %40 = arith.addf %38, %39 : vector<32x1xf32>
    %41 = math.rsqrt %40 : vector<32x1xf32>
    %42 = vector.broadcast %41 : vector<32x1xf32> to vector<32x128xf32>
    %43 = arith.mulf %33, %42 : vector<32x128xf32>
    %c0_14 = arith.constant 0 : index
    %c0_15 = arith.constant 0 : index
    %44 = vector.load %arg4[%c0_14, %c0_15] : memref<1x128xf32, #tpu.memory_space<vmem>>, vector<1x128xf32>
    %45 = vector.broadcast %44 : vector<1x128xf32> to vector<32x128xf32>
    %46 = arith.mulf %43, %45 : vector<32x128xf32>
    %c0_16 = arith.constant 0 : index
    %c0_17 = arith.constant 0 : index
    %47 = vector.load %arg5[%c0_16, %c0_17] : memref<1x128xf32, #tpu.memory_space<vmem>>, vector<1x128xf32>
    %48 = vector.broadcast %47 : vector<1x128xf32> to vector<32x128xf32>
    %49 = arith.addf %46, %48 : vector<32x128xf32>
    %50 = arith.addf %49, %8 : vector<32x128xf32>
    %c0_18 = arith.constant 0 : index
    %c0_19 = arith.constant 0 : index
    %51 = vector.load %arg6[%c0_18, %c0_19] : memref<32x128xf32, #tpu.memory_space<vmem>>, vector<32x128xf32>
    tpu.vector_store %arg6[%c0_18, %c0_19], %50 {strides = array<i32>} : memref<32x128xf32, #tpu.memory_space<vmem>>, vector<32x128xf32>,
    return
  }
  func.func @transform_0(%arg0: i32) -> (i32, i32) {
    %c0_i32 = arith.constant 0 : i32
    %c0_i32_0 = arith.constant 0 : i32
    return %arg0, %c0_i32 : i32, i32
  }
  func.func @transform_1(%arg0: i32) -> (i32, i32) {
    %c0_i32 = arith.constant 0 : i32
    %c0_i32_0 = arith.constant 0 : i32
    %c0_i32_1 = arith.constant 0 : i32
    return %c0_i32, %c0_i32_0 : i32, i32
  }
  func.func @transform_2(%arg0: i32) -> (i32, i32) {
    %c0_i32 = arith.constant 0 : i32
    %c0_i32_0 = arith.constant 0 : i32
    %c0_i32_1 = arith.constant 0 : i32
    return %c0_i32, %c0_i32_0 : i32, i32
  }
  func.func @transform_3(%arg0: i32) -> (i32, i32) {
    %c0_i32 = arith.constant 0 : i32
    %c0_i32_0 = arith.constant 0 : i32
    %c0_i32_1 = arith.constant 0 : i32
    return %c0_i32, %c0_i32_0 : i32, i32
  }
  func.func @transform_4(%arg0: i32) -> (i32, i32) {
    %c0_i32 = arith.constant 0 : i32
    %c0_i32_0 = arith.constant 0 : i32
    %c0_i32_1 = arith.constant 0 : i32
    return %c0_i32, %c0_i32_0 : i32, i32
  }
  func.func @transform_5(%arg0: i32) -> (i32, i32) {
    %c0_i32 = arith.constant 0 : i32
    %c0_i32_0 = arith.constant 0 : i32
    return %arg0, %c0_i32 : i32, i32
  }
}

</mosaic_0001>

<bundles_post_ra>
// kernel: tpu_custom_call.1
= control target key start
LH: loop header
LB: loop body
LE: loop exit
PB: predicated region body
PF: predicated region fallthrough
CT: control target
= control target key end

     0   :  { %10 = vsyncpa [#allocation3], 0  ;;  %s1152_s0 = inlined_call_operand.hbm [shape: bf16[32,64], index: 0, kind: input, shape index: {}]   ;;  %s1153_s1 = inlined_call_operand.hbm [shape: bf16[64,384], index: 1, kind: input, shape index: {}]   ;;  %s1154_s2 = inlined_call_operand.vmem [shape: f32[1,384], index: 2, kind: input, shape index: {}]   ;;  %s1155_s3 = inlined_call_operand.vmem [shape: f32[1,128], index: 3, kind: input, shape index: {}]   ;;  %s1156_s4 = inlined_call_operand.vmem [shape: f32[1,128], index: 4, kind: input, shape index: {}]   ;;  %s1157_s5 = inlined_call_operand.hbm [shape: f32[32,128], index: 5, kind: output, shape index: {}]  }
   0x1   :  { %11 = vsyncpa [#allocation6], 0 }
   0x2   :  { %12 = vsyncpa [#allocation4], 0  ;;  %s1001_s18 = smov [#allocation2]   ;;  %s929_s22 = scalar_lea.hbm %s1152_s0, 256 }
   0x3   :  { %s18_s19 = sshll.u32 %s1001_s18, 4  ;;  %p930_p0 = scmp.ne.s32.totalorder %s1152_s0, %s929_s22  ;;  %s19_s19 = int_to_ptr.vmem [resolvable:$true] %s18_s19 }
   0x4   :  { %p933_p1 = scmp.lt.u32.totalorder %s929_s22, %s1152_s0 }
   0x6   :  { %p935_p2 = pnand %p933_p1, %p930_p0 }
   0x8   :  { %938 = shalt.err (!%p935_p2)
}
   0x9   :  { %s939_s27 = scalar_lea.vmem %s19_s19, 256  ;;  %p944_p4 = scmp.lt.s32.totalorder %s19_s19, %s19_s19 }
   0xa   :  { %p940_p3 = scmp.ne.s32.totalorder %s19_s19, %s939_s27  ;;  %p945_p5 = scmp.lt.s32.totalorder %s939_s27, %s939_s27 }
   0xc   :  { %p946_p6 = por %p945_p5, %p944_p4 }
   0xe   :  { %p947_p7 = pnand %p946_p6, %p940_p3 }
  0x10   :  { %950 = shalt.err (!%p947_p7)
}
  0x11   :  { %s1002_s28 = smov 64   ;;  %s1003_s29 = smov 4  }
  0x12   :  { %24 = dma.hbm_to_vmem [thread:$0]  %s1152_s0, 256, %s19_s19, [#allocation3], %s1002_s28, %s1002_s28, %s1003_s29  }
  0x13   :  { %s1004_s7 = smov [#allocation5]   ;;  %s951_s11 = scalar_lea.hbm %s1153_s1, 1536 }
  0x14   :  { %s30_s8 = sshll.u32 %s1004_s7, 4  ;;  %p952_p8 = scmp.ne.s32.totalorder %s1153_s1, %s951_s11  ;;  %s31_s8 = int_to_ptr.vmem [resolvable:$true] %s30_s8 }
  0x15   :  { %p955_p9 = scmp.lt.u32.totalorder %s951_s11, %s1153_s1 }
  0x17   :  { %p957_p10 = pnand %p955_p9, %p952_p8 }
  0x19   :  { %960 = shalt.err (!%p957_p10)
}
  0x1a   :  { %s961_s16 = scalar_lea.vmem %s31_s8, 1536  ;;  %p966_p12 = scmp.lt.s32.totalorder %s31_s8, %s31_s8 }
  0x1b   :  { %p962_p11 = scmp.ne.s32.totalorder %s31_s8, %s961_s16  ;;  %p967_p13 = scmp.lt.s32.totalorder %s961_s16, %s961_s16 }
  0x1d   :  { %p968_p0 = por %p967_p13, %p966_p12 }
  0x1f   :  { %p969_p1 = pnand %p968_p0, %p962_p11 }
  0x21   :  { %972 = shalt.err (!%p969_p1)
}
  0x22   :  { %s1005_s0 = smov 192   ;;  %s1006_s17 = smov 12  }
  0x23   :  { %36 = dma.hbm_to_vmem [thread:$0]  %s1153_s1, 1536, %s31_s8, [#allocation6], %s1005_s0, %s1005_s0, %s1006_s17  }
  0x24   :  { %995 = dma.done.wait [#allocation3], 256  }
  0x25   :  { %996 = vsyncadd [#allocation3], 4294967040 }
  0x26   :  { %997 = dma.done.wait [#allocation6], 1536  }
  0x27   :  { %998 = vsyncadd [#allocation6], 4294965760  ;;  %v1007_v0 = vmov 0   ;;  %v887_v1 = vld [vmem:[#allocation5 + $0x4] ss:$12 sps:$4 sm:$0xff]   ;;  %vm161_vm0 = vcmask 523264   ;;  %v72_v16 = vlaneseq }
  0x28   :  { %200 = vmatprep.mubr.bf16.mxu0 %v1007_v0  ;;  %v889_v2 = vld [vmem:[#allocation5] ss:$12 sps:$4 sm:$0xff]   ;;  %168 = vmatprep.subr.bf16.mxu0 %v887_v1  ;;  %v890_v3 = vld [vmem:[#allocation5 + $0x1c] ss:$12 sps:$4 sm:$0xff]   ;;  %v892_v4 = vld [vmem:[#allocation5 + $0x18] ss:$12 sps:$4 sm:$0xff]  }
  0x29   :  { %169 = vmatpush1.bf16.msra.mxu0 %v889_v2  ;;  %v893_v5 = vld [vmem:[#allocation5 + $0x34] ss:$12 sps:$4 sm:$0xff]   ;;  %v895_v6 = vld [vmem:[#allocation5 + $0x30] ss:$12 sps:$4 sm:$0xff]   ;;  %v896_v8 = vld [vmem:[#allocation5 + $0x4c] ss:$12 sps:$4 sm:$0xff]  }
  0x2a   :  { %170 = vmatprep.subr.bf16.mxu0 %v890_v3  ;;  %v899_v7 = vld [vmem:[#allocation2] sm:$0xff]   ;;  %v902_v10 = vld [vmem:[#allocation5 + $0x20] ss:$12 sps:$4 sm:$0xff]   ;;  %v903_v12 = vld [vmem:[#allocation5 + $0x38] ss:$12 sps:$4 sm:$0xff]   ;;  %v1008_v15 = vmov 0.0  }
  0x2b   :  { %v901_v9 = vld [vmem:[#allocation5 + $0x8] ss:$12 sps:$4 sm:$0xff]   ;;  %823 = vmatprep.mubr.msk.bf16.mxu1 %vm161_vm0, %v899_v7  ;;  %v904_v13 = vld [vmem:[#allocation5 + $0x50] ss:$12 sps:$4 sm:$0xff]   ;;  %vm1009_vm1 = vmmov 0   ;;  %v73_v17 = vshrl.u32 %v72_v16, 7 }
  0x2c   :  { %815 = vmatprep.subr.bf16.mxu1 %v901_v9  ;;  %v898_v11 = vld [vmem:[#allocation5 + $0x48] ss:$12 sps:$4 sm:$0xff]   ;;  %v900_v14 = vld [vmem:[#allocation2 + $0x8] sm:$0xff]   ;;  %v70_v19 = vld [vmem:[%s1154_s2] sm:$0x7]  ;;  %vm494_vm2 = vcmask 1043456  }
  0x2d   :  { %171 = vmatpush1.bf16.msra.mxu0 %v892_v4  ;;  %816 = vmatpush3.bf16.msra.mxu1 %v901_v9  ;;  %v74_v18 = vsub.s32 0, %v73_v17  ;;  %v78_v21 = vsub.s32 1, %v73_v17  ;;  %v82_v25 = vsub.s32 2, %v73_v17  ;;  %vm438_vm3 = vcmask 64512  }
  0x2e   :  { %172 = vmatprep.subr.bf16.mxu0 %v893_v5  ;;  %817 = vmatprep.subr.bf16.mxu1 %v902_v10 }
  0x2f   :  { %v75_v20 = vrot.slane %v70_v19, %v74_v18  ;;  %v79_v26 = vrot.slane %v70_v19, %v78_v21  ;;  %v83_v32 = vrot.slane %v70_v19, %v82_v25 }
  0x31   :  { %173 = vmatpush1.bf16.msra.mxu0 %v895_v6  ;;  %818 = vmatpush3.bf16.msra.mxu1 %v902_v10 }
  0x32   :  { %174 = vmatprep.subr.bf16.mxu0 %v896_v8  ;;  %819 = vmatprep.subr.bf16.mxu1 %v903_v12 }
  0x35   :  { %175 = vmatpush1.bf16.msra.mxu0 %v898_v11  ;;  %820 = vmatpush3.bf16.msra.mxu1 %v903_v12 }
  0x36   :  { %821 = vmatprep.subr.bf16.mxu1 %v904_v13  ;;  %833 = vmatprep.subr.bf16.mxu0 %v1008_v15 }
  0x38   :  { %783 = vmatmul.mubr.msk.bf16.vlgmr.msra.gmra.mrb[0].mxu0 %vm161_vm0, %v899_v7 }
  0x39   :  { %210 = vmatprep.mubr.bf16.mxu0 %v1007_v0  ;;  %822 = vmatpush3.bf16.msra.mxu1 %v904_v13 }
  0x3a   :  { %827 = vmatprep.subr.bf16.mxu1 %v1008_v15 }
  0x3c   :  { %824 = vmatmul.mubr.msk.bf16.vlgmr.msra.gmra.mrb[0].mxu1 %vm161_vm0, %v900_v14 }
  0x3d   :  { %829 = vmatprep.mubr.msk.bf16.mxu1 %vm1009_vm1, %v1008_v15 }
  0x40   :  { %784 = vmatmul.mubr.msk.bf16.gmra.mrb[4].mxu0 %vm161_vm0, %v900_v14 }
  0x41   :  { %835 = vmatprep.mubr.msk.bf16.mxu0 %vm1009_vm1, %v1008_v15 }
 0x10b   :  { %v202_v22 = vpop.f32.mrb[0].mxu0 }
 0x10c   :  { %v203_v23 = vadd.f32 %v202_v22, %v75_v20  ;;  %v204_v24 = vpop.f32.mrb[1].mxu0 }
 0x10d   :  { %v206_v27 = vpop.f32.mrb[2].mxu0  ;;  %v205_v33 = vadd.f32 %v204_v24, %v79_v26 }
 0x10e   :  { %v274_v28 = vpack.c.bf16 %v203_v23, %v203_v23  ;;  %v207_v29 = vadd.f32 %v206_v27, %v75_v20  ;;  %v208_v30 = vpop.f32.mrb[3].mxu0 }
 0x10f   :  { %v209_v34 = vadd.f32 %v208_v30, %v79_v26  ;;  %v825_v36 = vpop.f32.mrb[0].mxu1  ;;  %v270_v41 = vpack.c.bf16 %v205_v33, %v205_v33 }
 0x110   :  { %v275_v31 = vpack.c.bf16 %v207_v29, %v207_v29  ;;  %828 = vmatpush3.bf16.xpose.msra.mxu1 %v274_v28  ;;  %v1082_v39 = vadd.f32 %v825_v36, %v83_v32  ;;  %v255_v40 = vpop.f32.mrb[1].mxu1 }
 0x111   :  { %839 = vmatprep.subr.bf16.mxu1 %v1008_v15  ;;  %v826_v43 = vpop.f32.mrb[2].mxu1  ;;  %v271_v49 = vpack.c.bf16 %v209_v34, %v209_v34  ;;  %v1096_v55 = vadd.f32 %v255_v40, %v83_v32 }
 0x112   :  { %834 = vmatpush3.bf16.xpose.msra.mxu0 %v275_v31  ;;  %v1084_v47 = vadd.f32 %v826_v43, %v83_v32  ;;  %v258_v48 = vpop.f32.mrb[3].mxu1  ;;  %v489_v43 = vpack.c.bf16 %v1082_v39, %v1082_v39 }
 0x113   :  { %v212_v35 = vpop.f32.mrb[4].mxu0  ;;  %845 = vmatprep.subr.bf16.mxu0 %v1008_v15  ;;  %v1098_v56 = vadd.f32 %v258_v48, %v83_v32  ;;  %v487_v57 = vpack.c.bf16 %v1096_v55, %v1096_v55 }
 0x114   :  { %v213_v37 = vadd.f32 %v212_v35, %v75_v20  ;;  %v214_v38 = vpop.f32.mrb[5].mxu0 }
 0x115   :  { %v216_v42 = vpop.f32.mrb[6].mxu0  ;;  %v215_v51 = vadd.f32 %v214_v38, %v79_v26  ;;  %v488_v58 = vpack.c.bf16 %v1098_v56, %v1098_v56  ;;  %v496_v59 = vsel %vm494_vm2, %v487_v57, 0 }
 0x116   :  { %v276_v44 = vpack.c.bf16 %v213_v37, %v213_v37  ;;  %v217_v45 = vadd.f32 %v216_v42, %v75_v20  ;;  %v218_v46 = vpop.f32.mrb[7].mxu0 }
 0x117   :  { %830 = vmatmul.mubr.bf16.vlgmr.msra.gmra.mrb[4].mxu1 %v270_v41  ;;  %v219_v52 = vadd.f32 %v218_v46, %v79_v26  ;;  %v272_v53 = vpack.c.bf16 %v215_v51, %v215_v51  ;;  %v542_v60 = vsel %vm494_vm2, %v488_v58, 0  ;;  %v588_v51 = vsel %vm494_vm2, %v489_v43, 0  ;;  %v791_v43 = vld [vmem:[%s1155_s3] ss:$0 sm:$0xff]  ;;  %s1010_s3 = smov [#allocation7]  }
 0x118   :  { %v277_v50 = vpack.c.bf16 %v217_v45, %v217_v45  ;;  %840 = vmatpush3.bf16.xpose.msra.mxu1 %v276_v44  ;;  %841 = vmatprep.mubr.msk.bf16.mxu1 %vm1009_vm1, %v1008_v15 }
 0x119   :  { %836 = vmatmul.mubr.bf16.vlgmr.msra.gmra.mrb[8].mxu0 %v271_v49  ;;  %851 = vmatprep.subr.bf16.mxu1 %v1008_v15  ;;  %v273_v54 = vpack.c.bf16 %v219_v52, %v219_v52  ;;  %v490_v49 = vpack.c.bf16 %v1084_v47, %v1084_v47 }
 0x11a   :  { %846 = vmatpush3.bf16.xpose.msra.mxu0 %v277_v50  ;;  %847 = vmatprep.mubr.msk.bf16.mxu0 %vm1009_vm1, %v1008_v15 }
 0x11b   :  { %857 = vmatprep.subr.bf16.mxu0 %v1008_v15  ;;  %v634_v57 = vsel %vm494_vm2, %v490_v49, 0 }
 0x11f   :  { %842 = vmatmul.mubr.bf16.vlgmr.msra.gmra.mrb[8].mxu1 %v272_v53 }
 0x120   :  { %853 = vmatprep.mubr.msk.bf16.mxu1 %vm1009_vm1, %v1008_v15  ;;  %852 = vmatpush3.bf16.msra.mxu1 %v496_v59 }
 0x121   :  { %848 = vmatmul.mubr.bf16.vlgmr.msra.gmra.mrb[12].mxu0 %v273_v54  ;;  %863 = vmatprep.subr.bf16.mxu1 %v1008_v15 }
 0x122   :  { %859 = vmatprep.mubr.msk.bf16.mxu0 %vm1009_vm1, %v1008_v15  ;;  %858 = vmatpush3.bf16.msra.mxu0 %v542_v60 }
 0x123   :  { %869 = vmatprep.subr.bf16.mxu0 %v1008_v15 }
 0x1ea   :  { %v312_v61 = vpop.f32.mrb[4].mxu1 }
 0x1eb   :  { %v831_v62 = vpop.f32.mrb[5].mxu1  ;;  %v439_v63 = vsel %vm438_vm3, %v312_v61, -inf }
 0x1ec   :  { %v352_v0 = vpop.f32.mrb[8].mxu0  ;;  %440 = vmax.xlane.f32.xlu0 %v439_v63  ;;  %v315_v1 = vpop.f32.mrb[6].mxu1 }
 0x1ed   :  { %v832_v2 = vpop.f32.mrb[7].mxu1  ;;  %v837_v3 = vpop.f32.mrb[9].mxu0  ;;  %v442_v6 = vsel %vm438_vm3, %v352_v0, -inf }
 0x1ee   :  { %v355_v4 = vpop.f32.mrb[10].mxu0 }
 0x1ef   :  { %v838_v5 = vpop.f32.mrb[11].mxu0 }
 0x1f0   :  { %443 = vmax.xlane.f32.xlu0 %v442_v6 }
 0x1f2   :  { %v392_v7 = vpop.f32.mrb[8].mxu1 }
 0x1f3   :  { %v843_v8 = vpop.f32.mrb[9].mxu1  ;;  %v445_v9 = vsel %vm438_vm3, %v392_v7, -inf }
 0x1f4   :  { %v432_v10 = vpop.f32.mrb[12].mxu0  ;;  %446 = vmax.xlane.f32.xlu1 %v445_v9  ;;  %v395_v11 = vpop.f32.mrb[10].mxu1 }
 0x1f5   :  { %v844_v12 = vpop.f32.mrb[11].mxu1  ;;  %v849_v13 = vpop.f32.mrb[13].mxu0  ;;  %v448_v17 = vsel %vm438_vm3, %v432_v10, -inf }
 0x1f6   :  { %v435_v14 = vpop.f32.mrb[14].mxu0 }
 0x1f7   :  { %v850_v16 = vpop.f32.mrb[15].mxu0 }
 0x1f8   :  { %449 = vmax.xlane.f32.xlu1 %v448_v17 }
 0x279   :  { %v441_v18 = vpop.xlane.xlu0 %440 }
 0x27a   :  { %v451_v19 = vsub.f32 %v312_v61, %v441_v18 }
 0x27c   :  { %v455_v20 = vmul.f32 1.442695, %v451_v19 }
 0x27d   :  { %v444_v21 = vpop.xlane.xlu0 %443 }
 0x27e   :  { %905 = vpow2.f32 %v455_v20  ;;  %v452_v22 = vsub.f32 %v352_v0, %v444_v21 }
 0x280   :  { %v457_v23 = vmul.f32 1.442695, %v452_v22 }
 0x281   :  { %v447_v24 = vpop.xlane.xlu1 %446 }
 0x282   :  { %907 = vpow2.f32 %v457_v23  ;;  %v453_v25 = vsub.f32 %v392_v7, %v447_v24 }
 0x284   :  { %v459_v26 = vmul.f32 1.442695, %v453_v25 }
 0x285   :  { %v450_v27 = vpop.xlane.xlu1 %449 }
 0x286   :  { %909 = vpow2.f32 %v459_v26  ;;  %v454_v28 = vsub.f32 %v432_v10, %v450_v27 }
 0x288   :  { %v906_v29 = vpop.eup %905  ;;  %v461_v30 = vmul.f32 1.442695, %v454_v28 }
 0x289   :  { %v463_v31 = vsel %vm438_vm3, %v906_v29, 0.0 }
 0x28a   :  { %911 = vpow2.f32 %v461_v30  ;;  %464 = vadd.xlane.f32.xlu0 %v463_v31 }
 0x28c   :  { %v908_v32 = vpop.eup %907 }
 0x28d   :  { %v466_v33 = vsel %vm438_vm3, %v908_v32, 0.0 }
 0x28e   :  { %467 = vadd.xlane.f32.xlu1 %v466_v33 }
 0x290   :  { %v910_v34 = vpop.eup %909 }
 0x291   :  { %v469_v35 = vsel %vm438_vm3, %v910_v34, 0.0 }
 0x292   :  { %470 = vadd.xlane.f32.xlu0 %v469_v35 }
 0x294   :  { %v912_v36 = vpop.eup %911 }
 0x295   :  { %v472_v37 = vsel %vm438_vm3, %v912_v36, 0.0 }
 0x296   :  { %473 = vadd.xlane.f32.xlu1 %v472_v37 }
 0x317   :  { %v465_v38 = vpop.xlane.xlu0 %464 }
 0x318   :  { %913 = vrcp.f32 %v465_v38 }
 0x31b   :  { %v468_v40 = vpop.xlane.xlu1 %467 }
 0x31c   :  { %915 = vrcp.f32 %v468_v40 }
 0x31f   :  { %v471_v41 = vpop.xlane.xlu0 %470 }
 0x320   :  { %917 = vrcp.f32 %v471_v41 }
 0x322   :  { %v914_v42 = vpop.eup %913 }
 0x323   :  { %v476_v44 = vmul.f32 %v914_v42, %v906_v29  ;;  %v474_v45 = vpop.xlane.xlu1 %473 }
 0x324   :  { %919 = vrcp.f32 %v474_v45 }
 0x325   :  { %v483_v46 = vpack.c.bf16 %v476_v44, %v476_v44 }
 0x326   :  { %v916_v48 = vpop.eup %915 }
 0x327   :  { %v478_v50 = vmul.f32 %v916_v48, %v908_v32  ;;  %854 = vmatmul.mubr.msk.bf16.vlgmr.msra.gmra.mrb[12].mxu1 %vm438_vm3, %v483_v46  ;;  %v792_v46 = vld [vmem:[%s1156_s4] ss:$0 sm:$0xff]  ;;  %s756_s4 = sshll.u32 %s1010_s3, 4  ;;  %s757_s4 = int_to_ptr.vmem [resolvable:$true] %s756_s4 }
 0x328   :  { %864 = vmatpush3.bf16.msra.mxu1 %v588_v51  ;;  %865 = vmatprep.mubr.msk.bf16.mxu1 %vm1009_vm1, %v1008_v15  ;;  %s973_s24 = scalar_lea.vmem %s757_s4, 512  ;;  %p978_p3 = scmp.lt.s32.totalorder %s757_s4, %s757_s4 }
 0x329   :  { %v484_v52 = vpack.c.bf16 %v478_v50, %v478_v50  ;;  %p974_p2 = scmp.ne.s32.totalorder %s757_s4, %s973_s24  ;;  %p979_p4 = scmp.lt.s32.totalorder %s973_s24, %s973_s24 }
 0x32a   :  { %v918_v53 = vpop.eup %917 }
 0x32b   :  { %v480_v54 = vmul.f32 %v918_v53, %v910_v34  ;;  %860 = vmatmul.mubr.msk.bf16.vlgmr.msra.gmra.mrb[16].mxu0 %vm438_vm3, %v484_v52  ;;  %p980_p5 = por %p979_p4, %p978_p3 }
 0x32c   :  { %870 = vmatpush3.bf16.msra.mxu0 %v634_v57  ;;  %871 = vmatprep.mubr.msk.bf16.mxu0 %vm1009_vm1, %v1008_v15 }
 0x32d   :  { %v485_v58 = vpack.c.bf16 %v480_v54, %v480_v54  ;;  %p981_p6 = pnand %p980_p5, %p974_p2 }
 0x32e   :  { %v920_v59 = vpop.eup %919 }
 0x32f   :  { %v482_v60 = vmul.f32 %v920_v59, %v912_v36  ;;  %866 = vmatmul.mubr.msk.bf16.vlgmr.msra.gmra.mrb[16].mxu1 %vm438_vm3, %v485_v58 }
 0x331   :  { %v486_v61 = vpack.c.bf16 %v482_v60, %v482_v60 }
 0x333   :  { %872 = vmatmul.mubr.msk.bf16.vlgmr.msra.gmra.mrb[20].mxu0 %vm438_vm3, %v486_v61 }
 0x3fa   :  { %v532_v62 = vpop.f32.mrb[12].mxu1 }
 0x3fb   :  { %676 = vadd.xlane.f32.xlu0 %v532_v62  ;;  %v855_v63 = vpop.f32.mrb[13].mxu1 }
 0x3fc   :  { %v535_v0 = vpop.f32.mrb[14].mxu1 }
 0x3fd   :  { %v856_v1 = vpop.f32.mrb[15].mxu1 }
 0x3fe   :  { %v578_v2 = vpop.f32.mrb[16].mxu0 }
 0x3ff   :  { %678 = vadd.xlane.f32.xlu1 %v578_v2  ;;  %v861_v3 = vpop.f32.mrb[17].mxu0 }
 0x400   :  { %v581_v4 = vpop.f32.mrb[18].mxu0 }
 0x401   :  { %v862_v5 = vpop.f32.mrb[19].mxu0 }
 0x402   :  { %v624_v6 = vpop.f32.mrb[16].mxu1 }
 0x403   :  { %680 = vadd.xlane.f32.xlu0 %v624_v6  ;;  %v867_v15 = vpop.f32.mrb[17].mxu1 }
 0x404   :  { %v627_v7 = vpop.f32.mrb[18].mxu1 }
 0x405   :  { %v868_v8 = vpop.f32.mrb[19].mxu1 }
 0x406   :  { %v670_v9 = vpop.f32.mrb[20].mxu0 }
 0x407   :  { %682 = vadd.xlane.f32.xlu1 %v670_v9  ;;  %v873_v10 = vpop.f32.mrb[21].mxu0 }
 0x408   :  { %v673_v11 = vpop.f32.mrb[22].mxu0 }
 0x409   :  { %v874_v12 = vpop.f32.mrb[23].mxu0 }
 0x488   :  { %v677_v13 = vpop.xlane.xlu0 %676 }
 0x489   :  { %v685_v14 = vmul.f32 0.0078125, %v677_v13 }
 0x48b   :  { %v689_v16 = vsub.f32 %v532_v62, %v685_v14 }
 0x48c   :  { %v679_v17 = vpop.xlane.xlu1 %678 }
 0x48d   :  { %v686_v18 = vmul.f32 0.0078125, %v679_v17  ;;  %v693_v19 = vmul.f32 %v689_v16, %v689_v16 }
 0x48f   :  { %v690_v20 = vsub.f32 %v578_v2, %v686_v18  ;;  %697 = vadd.xlane.f32.xlu0 %v693_v19 }
 0x490   :  { %v681_v21 = vpop.xlane.xlu0 %680 }
 0x491   :  { %v687_v22 = vmul.f32 0.0078125, %v681_v21  ;;  %v694_v23 = vmul.f32 %v690_v20, %v690_v20 }
 0x493   :  { %v691_v24 = vsub.f32 %v624_v6, %v687_v22  ;;  %699 = vadd.xlane.f32.xlu1 %v694_v23 }
 0x494   :  { %v683_v25 = vpop.xlane.xlu1 %682 }
 0x495   :  { %v688_v26 = vmul.f32 0.0078125, %v683_v25  ;;  %v695_v27 = vmul.f32 %v691_v24, %v691_v24 }
 0x497   :  { %v692_v28 = vsub.f32 %v670_v9, %v688_v26  ;;  %701 = vadd.xlane.f32.xlu0 %v695_v27 }
 0x499   :  { %v696_v29 = vmul.f32 %v692_v28, %v692_v28 }
 0x49b   :  { %703 = vadd.xlane.f32.xlu1 %v696_v29 }
 0x51c   :  { %v698_v30 = vpop.xlane.xlu0 %697 }
 0x51d   :  { %v705_v31 = vmul.f32 0.0078125, %v698_v30 }
 0x51f   :  { %v709_v32 = vadd.f32 1e-05, %v705_v31 }
 0x520   :  { %v700_v33 = vpop.xlane.xlu1 %699 }
 0x521   :  { %921 = vrsqrt.f32 %v709_v32  ;;  %v706_v34 = vmul.f32 0.0078125, %v700_v33 }
 0x523   :  { %v710_v35 = vadd.f32 1e-05, %v706_v34 }
 0x524   :  { %v702_v36 = vpop.xlane.xlu0 %701 }
 0x525   :  { %923 = vrsqrt.f32 %v710_v35  ;;  %v707_v37 = vmul.f32 0.0078125, %v702_v36 }
 0x527   :  { %v711_v38 = vadd.f32 1e-05, %v707_v37 }
 0x528   :  { %v704_v40 = vpop.xlane.xlu1 %703 }
 0x529   :  { %925 = vrsqrt.f32 %v711_v38  ;;  %v708_v41 = vmul.f32 0.0078125, %v704_v40 }
 0x52b   :  { %v922_v42 = vpop.eup %921  ;;  %v712_v44 = vadd.f32 1e-05, %v708_v41 }
 0x52c   :  { %v717_v45 = vmul.f32 %v922_v42, %v689_v16 }
 0x52d   :  { %927 = vrsqrt.f32 %v712_v44 }
 0x52e   :  { %v728_v48 = vmul.f32 %v791_v43, %v717_v45 }
 0x52f   :  { %v924_v49 = vpop.eup %923 }
 0x530   :  { %v739_v50 = vadd.f32 %v792_v46, %v728_v48  ;;  %v718_v51 = vmul.f32 %v924_v49, %v690_v20 }
 0x532   :  { %v729_v52 = vmul.f32 %v791_v43, %v718_v51  ;;  %v743_v53 = vadd.f32 %v739_v50, %v1096_v55 }
 0x533   :  { %v926_v54 = vpop.eup %925 }
 0x534   :  { %v740_v57 = vadd.f32 %v792_v46, %v729_v52  ;;  %v719_v58 = vmul.f32 %v926_v54, %v691_v24  ;;  %747 = vst [vmem:[#allocation7] sm:$0xff] %v743_v53 }
 0x536   :  { %v730_v59 = vmul.f32 %v791_v43, %v719_v58  ;;  %v744_v60 = vadd.f32 %v740_v57, %v1098_v56 }
 0x537   :  { %v928_v61 = vpop.eup %927 }
 0x538   :  { %v741_v62 = vadd.f32 %v792_v46, %v730_v59  ;;  %v720_v63 = vmul.f32 %v928_v61, %v692_v28  ;;  %748 = vst [vmem:[#allocation7 + $0x8] sm:$0xff] %v744_v60 }
 0x53a   :  { %v731_v0 = vmul.f32 %v791_v43, %v720_v63  ;;  %v745_v1 = vadd.f32 %v741_v62, %v1082_v39 }
 0x53c   :  { %v742_v2 = vadd.f32 %v792_v46, %v731_v0  ;;  %749 = vst [vmem:[#allocation7 + $0x10] sm:$0xff] %v745_v1 }
 0x53e   :  { %v746_v55 = vadd.f32 %v742_v2, %v1084_v47 }
 0x540   :  { %750 = vst [vmem:[#allocation7 + $0x18] sm:$0xff] %v746_v55 }
 0x541   :  { %984 = shalt.err (!%p981_p6)
}
 0x542   :  { %s985_s27 = scalar_lea.hbm %s1157_s5, 512 }
 0x543   :  { %p986_p7 = scmp.ne.s32.totalorder %s1157_s5, %s985_s27  ;;  %p989_p8 = scmp.lt.u32.totalorder %s985_s27, %s1157_s5 }
 0x545   :  { %p991_p9 = pnand %p989_p8, %p986_p7 }
 0x547   :  { %994 = shalt.err (!%p991_p9)
}
 0x548   :  { %s1011_s7 = smov 128   ;;  %s1012_s8 = smov 8  }
 0x549   :  { %762 = dma.vmem_to_hbm [thread:$0]  %s757_s4, 512, %s1157_s5, [#allocation4], %s1011_s7, %s1011_s7, %s1012_s8  }
 0x54a   :  { %999 = dma.done.wait [#allocation4], 512  }
 0x54b   :  { %1000 = vsyncadd [#allocation4], 4294966784 }
 0x54c   :  { %766 = vsyncpa [#allocation3], 1 }
 0x54d   :  { %767 = vsyncpa [#allocation6], 1 }
 0x54e   :  { %768 = vsyncpa [#allocation4], 1 }

</bundles_post_ra>
